<compile_context>
chip_gen: v5e
topology: v5e:2x2
jax: 0.10.0
libtpu: 0.0.40
codegen_flags: <defaults>
</compile_context>

<pallas_src>
import functools

import jax
import jax.numpy as jnp
from jax import lax
from jax.experimental import pallas as pl
from jax.experimental.pallas import tpu as pltpu


def _round_up(x, m):
    return ((x + m - 1) // m) * m


def _choose_batch_tile(batch):
    # Prefer large, 8-divisible batch tiles (fills MXU rows, gives megacore >=2 tiles
    # at real batch sizes); otherwise fall back to the full batch (block == full dim).
    for cand in (256, 128, 64, 32, 16, 8):
        if batch % cand == 0:
            return cand
    return batch


def _choose_spatial_tile(s_pad, t_rows):
    # Keep each x buffer <= ~8 MiB so 2 buffers fit comfortably on v7x (64 MiB VMEM).
    budget_lanes = max(128, ((8 * 1024 * 1024) // (4 * t_rows)) // 128 * 128)
    # Prefer >= 2 spatial steps so the DMA pipeline actually overlaps with compute.
    if s_pad >= 256:
        budget_lanes = min(budget_lanes, max(128, (s_pad // 2) // 128 * 128))
    ts = max(128, min(s_pad, budget_lanes) // 128 * 128)
    while ts > 128 and s_pad % ts != 0:
        ts -= 128
    return ts


def _concept_kernel(x_ref, wbexp_ref, wfc_ref, bfc_ref,
                    prob_ref, logit_ref, acc_ref,
                    *, t_b, c_pad, t_s, inv_spatial):
    t_rows = t_b * c_pad
    s_idx = pl.program_id(1)

    @pl.when(s_idx == 0)
    def _init():
        acc_ref[...] = jnp.zeros_like(acc_ref)

    # Per-tile lane-partial sums: static 128-lane slices keep the adds on the VALU;
    # only one cross-lane (XLU) reduce happens, in the epilogue below.
    x = x_ref[...].astype(jnp.float32)                      # [t_rows, t_s] (f32 accumulation)
    partial = x[:, 0:128]
    for k in range(1, t_s // 128):
        partial = partial + x[:, k * 128:(k + 1) * 128]
    acc_ref[...] += partial

    @pl.when(s_idx == pl.num_programs(1) - 1)
    def _epilogue():
        # Global-average-pool per (sample, channel) row.
        pooled = jnp.sum(acc_ref[...], axis=-1, keepdims=True) * inv_spatial   # [t_rows, 1]
        # Stand-in backbone projection without any in-kernel reshape: scale the
        # row-tiled projection weight, then collapse each sample's channel rows with a
        # constant 0/1 selector matmul on the MXU.
        scaled = pooled * wbexp_ref[...]                                        # [t_rows, in_dim]
        r_ids = lax.broadcasted_iota(jnp.int32, (t_b, t_rows), 1)
        b_ids = lax.broadcasted_iota(jnp.int32, (t_b, t_rows), 0)
        sel = jnp.logical_and(r_ids >= b_ids * c_pad,
                              r_ids < (b_ids + 1) * c_pad).astype(jnp.float32)  # [t_b, t_rows]
        feats = jnp.dot(sel, scaled, preferred_element_type=jnp.float32)        # [t_b, in_dim]
        # fc head: Dropout (identity in eval) -> Linear(in_dim, concept_dim) + bias.
        logits = jnp.dot(feats, wfc_ref[...],
                         preferred_element_type=jnp.float32) + bfc_ref[...]     # [t_b, CP(=128)]
        logit_ref[...] = logits                       # lane-dense (128-wide) full stores
        prob_ref[...] = jax.nn.sigmoid(logits)        # torch.sigmoid(logits)


def concept_predictor_forward(x_nchw, w_backbone, w_fc, b_fc):
    """x_nchw: [B, C, H, W].  Returns (probs, logits), each [B, concept_dim] float32."""
    B, C, H, W = x_nchw.shape
    in_dim = w_backbone.shape[1]
    concept_dim = w_fc.shape[1]

    spatial = H * W
    c_pad = max(8, _round_up(C, 8))            # channels folded into sublane-friendly rows
    s_pad = _round_up(spatial, 128)            # lane axis padded to 128 multiples
    cp = _round_up(concept_dim, 128)           # lane-dense output width

    t_b = _choose_batch_tile(B)
    t_rows = t_b * c_pad
    t_s = _choose_spatial_tile(s_pad, t_rows)

    # ---- layout glue (plain JAX): [B,C,H,W] -> zero-padded [B*C_pad, S_pad] ----
    x3 = x_nchw.reshape(B, C, spatial).astype(jnp.float32)
    x3 = jnp.pad(x3, ((0, 0), (0, c_pad - C), (0, s_pad - spatial)))
    x2 = x3.reshape(B * c_pad, s_pad)

    wb_pad = jnp.pad(w_backbone.astype(jnp.float32), ((0, c_pad - C), (0, 0)))
    wb_exp = jnp.tile(wb_pad, (t_b, 1))                                         # [t_rows, in_dim]
    wfc_pad = jnp.pad(w_fc.astype(jnp.float32), ((0, 0), (0, cp - concept_dim)))
    bfc_pad = jnp.pad(b_fc.astype(jnp.float32), (0, cp - concept_dim)).reshape(1, cp)

    grid = (B // t_b, s_pad // t_s)            # (batch tiles [parallel], spatial [arbitrary])

    kernel = functools.partial(_concept_kernel, t_b=t_b, c_pad=c_pad, t_s=t_s,
                               inv_spatial=1.0 / float(spatial))

    # Explicit VMEM budget: x double-buffer + resident weights + outputs + scratch.
    vmem_bytes = 4 * (2 * t_rows * t_s + 2 * t_rows * in_dim + 2 * in_dim * cp
                      + 2 * cp + 4 * t_b * cp + t_rows * 128)
    vmem_limit = int(min(max(2 * vmem_bytes, 16 * 1024 * 1024), 48 * 1024 * 1024))

    probs_p, logits_p = pl.pallas_call(
        kernel,
        out_shape=(
            jax.ShapeDtypeStruct((B, cp), jnp.float32),
            jax.ShapeDtypeStruct((B, cp), jnp.float32),
        ),
        grid=grid,
        in_specs=[
            pl.BlockSpec((t_rows, t_s), lambda b, s: (b, s)),      # pipelined image tiles
            pl.BlockSpec((t_rows, in_dim), lambda b, s: (0, 0)),   # resident stand-in proj
            pl.BlockSpec((in_dim, cp), lambda b, s: (0, 0)),       # resident fc weight
            pl.BlockSpec((1, cp), lambda b, s: (0, 0)),            # resident fc bias
        ],
        out_specs=(
            pl.BlockSpec((t_b, cp), lambda b, s: (b, 0)),          # resident across s-axis
            pl.BlockSpec((t_b, cp), lambda b, s: (b, 0)),
        ),
        scratch_shapes=[pltpu.VMEM((t_rows, 128), jnp.float32)],   # lane-partial pool sums
        compiler_params=pltpu.CompilerParams(
            dimension_semantics=("parallel", "arbitrary"),
            vmem_limit_bytes=vmem_limit,
        ),
    )(x2, wb_exp, wfc_pad, bfc_pad)

    return probs_p[:, :concept_dim], logits_p[:, :concept_dim]


if __name__ == "__main__":
    # Small shapes consistent with the module's forward (image in, 96 concept logits out).
    B, C, H, W = 2, 4, 16, 16
    in_dim = 32          # small stand-in for backbone.num_features (1024 for swin_base)
    concept_dim = 96

    key = jax.random.PRNGKey(0)
    kx, kb, kw = jax.random.split(key, 3)

    x = jax.random.normal(kx, (B, C, H, W), dtype=jnp.float32)

    # Deterministic parameter init.
    w_backbone = jax.random.normal(kb, (C, in_dim), dtype=jnp.float32) * 0.1
    # fc weight: trunc_normal std=0.02 (torch init), bias zeros.
    w_fc = (jax.random.truncated_normal(kw, -2.0, 2.0, (in_dim, concept_dim),
                                        dtype=jnp.float32) * 0.02)
    b_fc = jnp.zeros((concept_dim,), dtype=jnp.float32)

    probs, logits = concept_predictor_forward(x, w_backbone, w_fc, b_fc)
    jax.block_until_ready((probs, logits))

    # Pure-JAX reference check.
    pooled_ref = jnp.mean(x.reshape(B, C, H * W), axis=-1)
    feats_ref = pooled_ref @ w_backbone
    logits_ref = feats_ref @ w_fc + b_fc
    probs_ref = jax.nn.sigmoid(logits_ref)
    assert probs.shape == (B, concept_dim) and logits.shape == (B, concept_dim)
    assert jnp.allclose(logits, logits_ref, atol=1e-4, rtol=1e-4)
    assert jnp.allclose(probs, probs_ref, atol=1e-4, rtol=1e-4)

    print("KERNEL_OK")
</pallas_src>

<mosaic_0001>
module attributes {stable_mosaic.version = 11 : i64} {
  func.func @_concept_kernel(%arg0: i32, %arg1: i32, %arg2: memref<16x128xf32, #tpu.memory_space<vmem>>, %arg3: memref<16x32xf32, #tpu.memory_space<vmem>>, %arg4: memref<32x128xf32, #tpu.memory_space<vmem>>, %arg5: memref<1x128xf32, #tpu.memory_space<vmem>>, %arg6: memref<2x128xf32, #tpu.memory_space<vmem>>, %arg7: memref<2x128xf32, #tpu.memory_space<vmem>>, %arg8: memref<16x128xf32, #tpu.memory_space<vmem>>) attributes {dimension_semantics = [#tpu.dimension_semantics<parallel>, #tpu.dimension_semantics<arbitrary>], iteration_bounds = array<i64: 1, 2>, scalar_prefetch = 0 : i64, scratch_operands = 1 : i64, tpu.core_type = #tpu.core_type<tc>, window_params = [{transform_indices = @transform_0, window_bounds = array<i64: 16, 128>}, {pipeline_mode = #tpu.pipeline_mode<synchronous>, transform_indices = @transform_1, window_bounds = array<i64: 16, 32>}, {pipeline_mode = #tpu.pipeline_mode<synchronous>, transform_indices = @transform_2, window_bounds = array<i64: 32, 128>}, {pipeline_mode = #tpu.pipeline_mode<synchronous>, transform_indices = @transform_3, window_bounds = array<i64: 1, 128>}, {transform_indices = @transform_4, window_bounds = array<i64: 2, 128>}, {transform_indices = @transform_5, window_bounds = array<i64: 2, 128>}]} {
    %c0_i32 = arith.constant 0 : i32
    %0 = arith.cmpi eq, %arg1, %c0_i32 : i32
    %1 = arith.extui %0 : i1 to i32
    %c0_i32_0 = arith.constant 0 : i32
    %2 = arith.cmpi ne, %1, %c0_i32_0 : i32
    scf.if %2 {
      %cst = arith.constant 0.000000e+00 : f32
      %10 = vector.broadcast %cst : f32 to vector<16x128xf32>
      %c0_7 = arith.constant 0 : index
      %c0_8 = arith.constant 0 : index
      %11 = vector.load %arg8[%c0_7, %c0_8] : memref<16x128xf32, #tpu.memory_space<vmem>>, vector<16x128xf32>
      tpu.vector_store %arg8[%c0_7, %c0_8], %10 {strides = array<i32>} : memref<16x128xf32, #tpu.memory_space<vmem>>, vector<16x128xf32>,
    } else {
    }
    %c0 = arith.constant 0 : index
    %c0_1 = arith.constant 0 : index
    %3 = vector.load %arg2[%c0, %c0_1] : memref<16x128xf32, #tpu.memory_space<vmem>>, vector<16x128xf32>
    %c0_2 = arith.constant 0 : index
    %c0_3 = arith.constant 0 : index
    %4 = vector.load %arg8[%c0_2, %c0_3] : memref<16x128xf32, #tpu.memory_space<vmem>>, vector<16x128xf32>
    %5 = arith.addf %4, %3 : vector<16x128xf32>
    %c0_4 = arith.constant 0 : index
    %c0_5 = arith.constant 0 : index
    %6 = vector.load %arg8[%c0_4, %c0_5] : memref<16x128xf32, #tpu.memory_space<vmem>>, vector<16x128xf32>
    tpu.vector_store %arg8[%c0_4, %c0_5], %5 {strides = array<i32>} : memref<16x128xf32, #tpu.memory_space<vmem>>, vector<16x128xf32>,
    %c1_i32 = arith.constant 1 : i32
    %7 = arith.cmpi eq, %arg1, %c1_i32 : i32
    %8 = arith.extui %7 : i1 to i32
    %c0_i32_6 = arith.constant 0 : i32
    %9 = arith.cmpi ne, %8, %c0_i32_6 : i32
    scf.if %9 {
      %c0_7 = arith.constant 0 : index
      %c0_8 = arith.constant 0 : index
      %10 = vector.load %arg8[%c0_7, %c0_8] : memref<16x128xf32, #tpu.memory_space<vmem>>, vector<16x128xf32>
      %cst = arith.constant dense<0.000000e+00> : vector<16xf32>
      %11 = vector.multi_reduction <add>, %10, %cst [1] : vector<16x128xf32> to vector<16xf32>
      %12 = vector.shape_cast %11 : vector<16xf32> to vector<16x1xf32>
      %cst_9 = arith.constant 3.906250e-03 : f32
      %13 = vector.broadcast %cst_9 : f32 to vector<16x1xf32>
      %14 = arith.mulf %12, %13 : vector<16x1xf32>
      %c0_10 = arith.constant 0 : index
      %c0_11 = arith.constant 0 : index
      %15 = vector.load %arg3[%c0_10, %c0_11] : memref<16x32xf32, #tpu.memory_space<vmem>>, vector<16x32xf32>
      %16 = vector.broadcast %14 : vector<16x1xf32> to vector<16x32xf32>
      %17 = arith.mulf %16, %15 : vector<16x32xf32>
      %18 = tpu.iota {dimensions = array<i32: 1>} : vector<2x16xi32>
      %19 = tpu.iota {dimensions = array<i32: 0>} : vector<2x16xi32>
      %c8_i32 = arith.constant 8 : i32
      %20 = vector.broadcast %c8_i32 : i32 to vector<2x16xi32>
      %21 = arith.muli %19, %20 : vector<2x16xi32>
      %22 = arith.cmpi sge, %18, %21 : vector<2x16xi32>
      %c1_i32_12 = arith.constant 1 : i32
      %23 = vector.broadcast %c1_i32_12 : i32 to vector<2x16xi32>
      %24 = arith.addi %19, %23 : vector<2x16xi32>
      %c8_i32_13 = arith.constant 8 : i32
      %25 = vector.broadcast %c8_i32_13 : i32 to vector<2x16xi32>
      %26 = arith.muli %24, %25 : vector<2x16xi32>
      %27 = arith.cmpi slt, %18, %26 : vector<2x16xi32>
      %28 = arith.andi %22, %27 : vector<2x16xi1>
      %29 = arith.extui %28 : vector<2x16xi1> to vector<2x16xi32>
      %30 = arith.sitofp %29 : vector<2x16xi32> to vector<2x16xf32>
      %cst_14 = arith.constant dense<0.000000e+00> : vector<2x32xf32>
      %31 = tpu.matmul %30, %17, %cst_14 {dimension_numbers = #tpu.dot_dimension_numbers<[1], [0], [0], [1], [0, 0, 1, 1], [], []>} : vector<2x16xf32>, vector<16x32xf32>, vector<2x32xf32> -> vector<2x32xf32>
      %c0_15 = arith.constant 0 : index
      %c0_16 = arith.constant 0 : index
      %32 = vector.load %arg4[%c0_15, %c0_16] : memref<32x128xf32, #tpu.memory_space<vmem>>, vector<32x128xf32>
      %cst_17 = arith.constant dense<0.000000e+00> : vector<2x128xf32>
      %33 = tpu.matmul %31, %32, %cst_17 {dimension_numbers = #tpu.dot_dimension_numbers<[1], [0], [0], [1], [0, 0, 1, 1], [], []>} : vector<2x32xf32>, vector<32x128xf32>, vector<2x128xf32> -> vector<2x128xf32>
      %c0_18 = arith.constant 0 : index
      %c0_19 = arith.constant 0 : index
      %34 = vector.load %arg5[%c0_18, %c0_19] : memref<1x128xf32, #tpu.memory_space<vmem>>, vector<1x128xf32>
      %35 = vector.broadcast %34 : vector<1x128xf32> to vector<2x128xf32>
      %36 = arith.addf %33, %35 : vector<2x128xf32>
      %c0_20 = arith.constant 0 : index
      %c0_21 = arith.constant 0 : index
      %37 = vector.load %arg7[%c0_20, %c0_21] : memref<2x128xf32, #tpu.memory_space<vmem>>, vector<2x128xf32>
      tpu.vector_store %arg7[%c0_20, %c0_21], %36 {strides = array<i32>} : memref<2x128xf32, #tpu.memory_space<vmem>>, vector<2x128xf32>,
      %38 = arith.negf %36 : vector<2x128xf32>
      %39 = math.exp %38 : vector<2x128xf32>
      %cst_22 = arith.constant 1.000000e+00 : f32
      %40 = vector.broadcast %cst_22 : f32 to vector<2x128xf32>
      %41 = arith.addf %40, %39 : vector<2x128xf32>
      %42 = arith.divf %40, %41 : vector<2x128xf32>
      %c0_23 = arith.constant 0 : index
      %c0_24 = arith.constant 0 : index
      %43 = vector.load %arg6[%c0_23, %c0_24] : memref<2x128xf32, #tpu.memory_space<vmem>>, vector<2x128xf32>
      tpu.vector_store %arg6[%c0_23, %c0_24], %42 {strides = array<i32>} : memref<2x128xf32, #tpu.memory_space<vmem>>, vector<2x128xf32>,
    } else {
    }
    return
  }
  func.func @transform_0(%arg0: i32, %arg1: i32) -> (i32, i32) {
    %c0_i32 = arith.constant 0 : i32
    return %arg0, %arg1 : i32, i32
  }
  func.func @transform_1(%arg0: i32, %arg1: i32) -> (i32, i32) {
    %c0_i32 = arith.constant 0 : i32
    %c0_i32_0 = arith.constant 0 : i32
    %c0_i32_1 = arith.constant 0 : i32
    return %c0_i32, %c0_i32_0 : i32, i32
  }
  func.func @transform_2(%arg0: i32, %arg1: i32) -> (i32, i32) {
    %c0_i32 = arith.constant 0 : i32
    %c0_i32_0 = arith.constant 0 : i32
    %c0_i32_1 = arith.constant 0 : i32
    return %c0_i32, %c0_i32_0 : i32, i32
  }
  func.func @transform_3(%arg0: i32, %arg1: i32) -> (i32, i32) {
    %c0_i32 = arith.constant 0 : i32
    %c0_i32_0 = arith.constant 0 : i32
    %c0_i32_1 = arith.constant 0 : i32
    return %c0_i32, %c0_i32_0 : i32, i32
  }
  func.func @transform_4(%arg0: i32, %arg1: i32) -> (i32, i32) {
    %c0_i32 = arith.constant 0 : i32
    %c0_i32_0 = arith.constant 0 : i32
    return %arg0, %c0_i32 : i32, i32
  }
  func.func @transform_5(%arg0: i32, %arg1: i32) -> (i32, i32) {
    %c0_i32 = arith.constant 0 : i32
    %c0_i32_0 = arith.constant 0 : i32
    return %arg0, %c0_i32 : i32, i32
  }
}

</mosaic_0001>

<bundles_post_ra>
// kernel: tpu_custom_call.1
= control target key start
LH: loop header
LB: loop body
LE: loop exit
PB: predicated region body
PF: predicated region fallthrough
CT: control target
= control target key end

     0   :  { %11 = vsyncpa [#allocation4], 0  ;;  %s1054_s0 = inlined_call_operand.hbm [shape: f32[16,256], index: 0, kind: input, shape index: {}]   ;;  %s1055_s1 = inlined_call_operand.hbm [shape: f32[16,32], index: 1, kind: input, shape index: {}]   ;;  %s1056_s2 = inlined_call_operand.hbm [shape: f32[32,128], index: 2, kind: input, shape index: {}]   ;;  %s1057_s3 = inlined_call_operand.vmem [shape: f32[1,128], index: 3, kind: input, shape index: {}]   ;;  %s1058_s4 = inlined_call_operand.hbm [shape: f32[2,128], index: 4, kind: output, shape index: {0}]   ;;  %s1059_s5 = inlined_call_operand.hbm [shape: f32[2,128], index: 5, kind: output, shape index: {1}]  }
   0x1   :  { %13 = vsyncpa [#allocation4 + $0x1], 0 }
   0x2   :  { %14 = vsyncpa [#allocation7], 0 }
   0x3   :  { %15 = vsyncpa [#allocation5], 0 }
   0x4   :  { %16 = vsyncpa [#allocation11], 0  ;;  %s904_s18 = smov 0   ;;  %s906_s19 = smov 0  }
   0x5   :  { %s908_s20 = smov 0   ;;  %s910_s21 = smov 0  }
   0x6   :  { %s912_s22 = smov 0   ;;  %s914_s23 = smov 0  }
   0x7 LB: > { %s1060_s24 = sadd.s32 4294967295, %s863_s23   ;;  %p56_p0 = scmp.ne.s32.totalorder %s847_s19, %s843_s18  ;;  %s863_s23 = sphi %s914_s23, %s22_s23   ;;  %s859_s22 = sphi %s912_s22, %s1073_s22   ;;  %s855_s21 = sphi %s910_s21, %s1072_s21   ;;  %s851_s20 = sphi %s908_s20, %s1071_s20   ;;  %s847_s19 = sphi %s906_s19, %s1070_s19   ;;  %s843_s18 = sphi %s904_s18, %s1069_s18  }
   0x8   : > { %p936_p1 = scmp.eq.s32.totalorder %s1060_s24, 0  ;;  %p533_p2 = scmp.ge.s32.totalorder %s863_s23, 1 }
   0x9   : > { %p182_p3 = scmp.lt.s32.totalorder %s863_s23, 3  ;;  %s193_s29 = sshll.u32 %s1055_s1, 4  ;;  %s194_s29 = int_to_ptr.hbm [resolvable:$true] %s193_s29 }
   0xa   : > { %p944_p4 = por %p936_p1, %p56_p0  ;;  %s865_s6 = smov [#allocation6]  }
   0xb   : > { %p951_p5 = pnand %p533_p2, %p182_p3  ;;  %s195_s7 = sshll.u32 %s865_s6, 4  ;;  %s196_s7 = int_to_ptr.vmem [resolvable:$true] %s195_s7 }
   0xc   : > { %s207_s10 = sshll.u32 %s1056_s2, 4  ;;  %s1061_s11 = smov 128   ;;  %s208_s10 = int_to_ptr.hbm [resolvable:$true] %s207_s10 }
   0xd   : > { %p573_p6 = pneg %p951_p5  ;;  %s867_s12 = smov 8  }
   0xe   : > { %s868_s13 = smov [#allocation8]   ;;  %s31_s15 = sadd.s32 1, %s859_s22 }
   0xf   : > { %p574_p7 = pnand %p573_p6, %p936_p1  ;;  %s209_s14 = sshll.u32 %s868_s13, 4  ;;  %s210_s14 = int_to_ptr.vmem [resolvable:$true] %s209_s14 }
  0x10   : > { %s43_s16 = sadd.s32 1, %s851_s20  ;;  %p32_p8 = scmp.ge.s32.totalorder %s31_s15, 2 }
  0x11   : > { %576 = dma.hbm_to_vmem [thread:$0]  (!%p574_p7), %s194_s29, 256, %s196_s7, [#allocation7], %s1061_s11, %s1061_s11, %s867_s12  }
  0x12   : > { %579 = dma.hbm_to_vmem [thread:$0]  (!%p574_p7), %s208_s10, 512, %s210_s14, [#allocation7], %s1061_s11, %s1061_s11, %s867_s12  }
  0x13   : > { %p50_p9 = scmp.ne.s32.totalorder %s851_s20, %s847_s19  ;;  %p51_p10 = scmp.eq.s32.totalorder %s863_s23, 0 }
  0x14   : > { %p586_p11 = scmp.lt.s32.totalorder %s863_s23, 2  ;;  %s1075_s15 = smov (%p32_p8, %s31_s15), 0 }
  0x15   : > { %p976_p12 = por %p51_p10, %p50_p9  ;;  %s226_s18 = sand.u32 1, %s851_s20  }
  0x16   : > { %s39_s27 = ssub.s32 %s859_s22, %s1075_s15  ;;  %s537_s28 = sshll.u32 %s226_s18, 4 }
  0x17   : > { %p41_p13 = scmp.eq.s32.totalorder %s39_s27, 0  ;;  %s538_s29 = sshll.u32 %s859_s22, 3 }
  0x18   : > { %s237_s9 = scalar_lea.hbm %s1054_s0, %s538_s29  ;;  %s230_s10 = scalar_lea.vmem [#allocation3], %s537_s28 }
  0x19   : > { %s985_s6 = scalar_select %p41_p13, %s851_s20, %s43_s16  }
  0x1a   : > { %s240_s13 = sshll.u32 %s230_s10, 4  ;;  %s238_s14 = sshll.u32 %s237_s9, 4  ;;  %s241_s13 = int_to_ptr.vmem [resolvable:$true] %s240_s13  ;;  %s239_s14 = int_to_ptr.hbm [resolvable:$true] %s238_s14 }
  0x1b   : > { %p581_p0 = pnand %p586_p11, %p976_p12  ;;  %s227_s24 = scalar_lea.sflag [#allocation4], %s226_s18 }
  0x1c   : > { %s869_s11 = smov 256   ;;  %s1066_s27 = smov 128  }
  0x1d   : > { %583 = dma.hbm_to_vmem [thread:$0]  (!%p581_p0), %s239_s14, 256, %s241_s13, %s227_s24, %s869_s11, %s1066_s27, %s867_s12  }
  0x1e   : > { %252 = sbr.rel (%p951_p5) target bundleno = 487 (0x1e7), region = 36  ;;  %s254_s16 = sand.u32 (!%p951_p5), 1, %s847_s19  }
  0x1f   : > { %s540_s29 = sshll.u32 (!%p951_p5), %s254_s16, 4  ;;  %s255_s28 = scalar_lea.sflag (!%p951_p5), [#allocation4], %s254_s16 }
  0x20   : > { %s258_s7 = scalar_lea.vmem (!%p951_p5), [#allocation3], %s540_s29 }
  0x23   : > { %826 = dma.done.wait (%p944_p4), %s255_s28, 256  }
  0x24   : > { %828 = vsyncadd (%p944_p4), %s255_s28, 4294967040 }
  0x25   : > { %830 = dma.done.wait (%p936_p1), [#allocation7], 768  }
  0x26   : > { %832 = vsyncadd (%p936_p1), [#allocation7], 4294966528  ;;  %p543_p2 = scmp.ne.s32.totalorder %s855_s21, 0 }
  0x28   : > { %295 = sbr.rel (%p543_p2) target bundleno = 48 (0x30), region = 52 }
  0x2d   : > { %v870_v0 = vmov 0.0  }
  0x2e   : > { %296 = vst [vmem:[#allocation2] sm:$0xff] %v870_v0 }
  0x2f   : > { %297 = vst [vmem:[#allocation2 + $0x8] sm:$0xff] %v870_v0 }
  0x30 PF: > { %v298_v1 = vld [vmem:[%s258_s7] sm:$0xff]  ;;  %v299_v3 = vld [vmem:[%s258_s7 + $0x8] sm:$0xff]  ;;  %p544_p3 = scmp.ne.s32.totalorder %s855_s21, 1 }
  0x35   : > { %v300_v2 = vld [vmem:[#allocation2] sm:$0xff]  ;;  %309 = sbr.rel (%p544_p3) target bundleno = 477 (0x1dd), region = 56 }
  0x36   : > { %v302_v4 = vadd.f32 %v300_v2, %v298_v1  ;;  %v301_v5 = vld [vmem:[#allocation2 + $0x8] sm:$0xff] }
  0x37   : > { %v303_v6 = vadd.f32 %v301_v5, %v299_v3 }
  0x38   : > { %304 = vst [vmem:[#allocation2] sm:$0xff] %v302_v4 }
  0x39   : > { %305 = vst [vmem:[#allocation2 + $0x8] sm:$0xff] %v303_v6 }
  0x3a   : > { %v361_v9 = vld [vmem:[#allocation8 + $0x18] sm:$0xff]  ;;  %v360_v10 = vld [vmem:[#allocation8 + $0x10] sm:$0xff]  ;;  %v359_v11 = vld [vmem:[#allocation8 + $0x8] sm:$0xff]  ;;  %v322_v12 = vlaneseq  ;;  %v871_v26 = vmov 0.0   ;;  %vm334_vm3 = vcmask 130048   ;;  %vm366_vm4 = vcmask 261120  }
  0x3b   : > { %382 = vmatpush.msra.mxu1 %v361_v9  ;;  %v319_v16 = vld [vmem:[#allocation6 + $0x8] sm:$0xff]  ;;  %v318_v23 = vld [vmem:[#allocation6] sm:$0xff]  ;;  %v358_v28 = vld [vmem:[#allocation8] sm:$0xff] }
  0x3c   : > { %v325_v13 = vshrl.u32 %v322_v12, 7  ;;  %v323_v18 = vand.u32 127, %v322_v12  ;;  %v650_v30 = vld [vmem:[%s1057_s3] ss:$0 sm:$0xff] }
  0x3d   : > { %383 = vmatpush.msra.mxu1 %v360_v10 }
  0x3e   : > { %v328_v14 = vadd.s32 1, %v325_v13  ;;  %v326_v19 = vmul.u32 8, %v325_v13 }
  0x3f   : > { %v310_v8 = vld [vmem:[#allocation2] sm:$0xff]  ;;  %384 = vmatpush.msra.mxu1 %v359_v11 }
  0x40   : > { %v311_v7 = vld [vmem:[#allocation2 + $0x8] sm:$0xff]  ;;  %v329_v20 = vmul.u32 8, %v328_v14  ;;  %vm327_vm0 = vcmp.ge.s32.totalorder %v323_v18, %v326_v19 }
  0x41   : > { %314 = vadd.xlane.f32.xlu0 %v311_v7  ;;  %385 = vmatpush.msra.mxu1 %v358_v28 }
  0x42   : > { %vm330_vm1 = vcmp.lt.s32.totalorder %v323_v18, %v329_v20 }
  0x43   : > { %vm331_vm2 = vmand %vm327_vm0, %vm330_vm1 }
  0x44   : > { %v545_v27 = vsel %vm331_vm2, 1.0, %v871_v26 }
  0x49   : > { %312 = vadd.xlane.f32.xlu0 %v310_v8 }
  0xb4   : > { %v315_v15 = vpop.xlane.xlu0 %314 }
  0xb5   : > { %v317_v17 = vmul.f32 0.00390625, %v315_v15 }
  0xb7   : > { %v321_v21 = vmul.f32 %v319_v16, %v317_v17 }
  0xb9   : > { %352 = vmatpush.msra.mxu0 %v321_v21 }
  0xbc   : > { %v313_v22 = vpop.xlane.xlu0 %312 }
  0xbd   : > { %v316_v24 = vmul.f32 0.00390625, %v313_v22 }
  0xbf   : > { %v320_v25 = vmul.f32 %v318_v23, %v316_v24 }
  0xc1   : > { %353 = vmatpush.msra.mxu0 %v320_v25 }
  0xc2   : > { %546 = vmatmul.msk.f32.vlgmr.msra.gmra.mxu0 %vm334_vm3, %v545_v27 }
 0x13f   : > { %v355_v29 = vpop.f32.mrf.mxu0 }
 0x140   : > { %547 = vmatmul.msk.f32.vlgmr.msra.gmra.mxu1 %vm366_vm4, %v355_v29 }
 0x1bd   : > { %v387_v31 = vpop.f32.mrf.mxu1 }
 0x1be   : > { %v388_v32 = vadd.f32 %v650_v30, %v387_v31 }
 0x1c0   : > { %390 = vst [vmem:[#allocation10] sm:$0x3] %v388_v32  ;;  %v548_v33 = vmul.f32 -1.442695, %v388_v32 }
 0x1c2   : > { %651 = vpow2.f32 %v548_v33 }
 0x1c8   : > { %v652_v34 = vpop.eup %651 }
 0x1c9   : > { %v394_v35 = vadd.f32 1.0, %v652_v34 }
 0x1cb   : > { %653 = vrcp.f32 %v394_v35  ;;  %v406_v39 = vand.u32 2147483648, %v394_v35  ;;  %v404_v41 = vand.u32 2147483647, %v394_v35  ;;  %vm400_vm6 = vweird.f32 %v394_v35 }
 0x1cd   : > { %v407_v43 = vor.u32 1.1754944e-38, %v406_v39  ;;  %vm405_vm8 = vcmp.eq.f32.partialorder %v404_v41, 8.507059e+37 }
 0x1d1   : > { %v654_v36 = vpop.eup %653 }
 0x1d2   : > { %v396_v37 = vmul.f32 %v654_v36, %v394_v35  ;;  %vm401_vm5 = vweird.f32 %v654_v36 }
 0x1d3   : > { %vm402_vm7 = vmor %vm400_vm6, %vm401_vm5 }
 0x1d4   : > { %v397_v38 = vsub.f32 1.0, %v396_v37 }
 0x1d6   : > { %v398_v40 = vmul.f32 %v654_v36, %v397_v38 }
 0x1d8   : > { %v399_v42 = vadd.f32 %v654_v36, %v398_v40 }
 0x1da   : > { %v403_v44 = vsel %vm402_vm7, %v654_v36, %v399_v42 }
 0x1db   : > { %v408_v45 = vsel %vm405_vm8, %v407_v43, %v403_v44 }
 0x1dc   : > { %410 = vst [vmem:[#allocation9] sm:$0x3] %v408_v45 }
 0x1dd PF: > { %s1067_s25 = sadd.s32 4294967295, %s863_s23   ;;  %s421_s12 = sshll.u32 %s1058_s4, 4  ;;  %s422_s12 = int_to_ptr.hbm [resolvable:$true] %s421_s12 }
 0x1de   : > { %p1014_p1 = scmp.eq.s32.totalorder %s1067_s25, 1  ;;  %s872_s17 = smov [#allocation9]  }
 0x1df   : > { %s419_s18 = sshll.u32 %s872_s17, 4  ;;  %s873_s8 = smov [#allocation10]   ;;  %s420_s18 = int_to_ptr.vmem [resolvable:$true] %s419_s18 }
 0x1e0   : > { %566 = dma.vmem_to_hbm [thread:$0]  (%p1014_p1), %s420_s18, 32, %s422_s12, [#allocation5]  }
 0x1e1   : > { %s433_s9 = sshll.u32 %s873_s8, 4  ;;  %s435_s14 = sshll.u32 %s1059_s5, 4  ;;  %s434_s9 = int_to_ptr.vmem [resolvable:$true] %s433_s9  ;;  %s436_s14 = int_to_ptr.hbm [resolvable:$true] %s435_s14 }
 0x1e2   : > { %568 = dma.vmem_to_hbm [thread:$0]  (%p1014_p1), %s434_s9, 32, %s436_s14, [#allocation11]  }
 0x1e3   : > { %834 = dma.done.wait (%p1014_p1), [#allocation5], 32  }
 0x1e4   : > { %836 = vsyncadd (%p1014_p1), [#allocation5], 4294967264 }
 0x1e5   : > { %838 = dma.done.wait (%p1014_p1), [#allocation11], 32  }
 0x1e6   : > { %840 = vsyncadd (%p1014_p1), [#allocation11], 4294967264 }
 0x1e7 PF: > { %s22_s23 = sadd.s32 1, %s863_s23   ;;  %s1069_s18 = smov %s847_s19 }
 0x1e8   : > { %p19_p4 = scmp.ge.s32.totalorder %s22_s23, 4   ;;  %s1070_s19 = smov %s851_s20 }
 0x1e9   : > { %s1071_s20 = smov %s985_s6  ;;  %s1072_s21 = smov %s859_s22 }
 0x1ea   : > { %s1073_s22 = smov %s1075_s15  ;;  %21 = sbr.rel (!%p19_p4) target bundleno = 7 (0x7), region = 99 }
 0x1ef   :  { %454 = vsyncpa [#allocation4], 1 }
 0x1f0   :  { %456 = vsyncpa [#allocation4 + $0x1], 1 }
 0x1f1   :  { %457 = vsyncpa [#allocation7], 1 }
 0x1f2   :  { %458 = vsyncpa [#allocation5], 1 }
 0x1f3   :  { %460 = vsyncpa [#allocation5 + $0x1], 1 }
 0x1f4   :  { %461 = vsyncpa [#allocation11], 1 }

</bundles_post_ra>
